<compile_context>
chip_gen: v5e
topology: v5e:2x2
jax: 0.10.0
libtpu: 0.0.40
codegen_flags: <defaults>
</compile_context>

<pallas_src>
import functools

import jax
import jax.numpy as jnp
from jax import lax
from jax.experimental import pallas as pl
from jax.experimental.pallas import tpu as pltpu


def _round_up(x, m):
    return (x + m - 1) // m * m


def relationv2_kernel(ft_ref, nb_ref, w_ft_ref, w_nb_ref, r_ref, o_ref):
    d_in = o_ref.shape[-1]
    mxu_dtype = w_ft_ref.dtype

    # Activations stream as f32; cast only the MXU operands (f32 path: no-op).
    ft32 = ft_ref[...]
    nb32 = nb_ref[...]

    # Two wide MXU matmuls (gamma | beta fused along the output axis),
    # f32 accumulation regardless of the operand dtype.
    pre = (jnp.dot(ft32.astype(mxu_dtype), w_ft_ref[...],
                   preferred_element_type=jnp.float32)
           + jnp.dot(nb32.astype(mxu_dtype), w_nb_ref[...],
                     preferred_element_type=jnp.float32))

    gamma_pre = pre[:, :d_in]           # lane-aligned slice (d_in multiple of 128)
    beta_pre = pre[:, d_in:]

    # leaky_relu(x, 0.2) == max(x, 0.2*x)
    gamma = jnp.maximum(gamma_pre, 0.2 * gamma_pre) + 1.0
    beta = jnp.maximum(beta_pre, 0.2 * beta_pre)

    r = r_ref[...]                      # (1, d_in) f32, broadcasts over rows
    m = ft32 + (gamma * r + beta) - nb32

    # F.normalize: m / max(||m||_2, 1e-12) == m * rsqrt(max(sum(m^2), 1e-24))
    sumsq = jnp.sum(m * m, axis=-1, keepdims=True)
    inv_norm = lax.rsqrt(jnp.maximum(sumsq, 1e-24))
    o_ref[...] = (m * inv_norm).astype(o_ref.dtype)


def relationv2(ft, neighbor, params, *, block_rows=512,
               compute_dtype=jnp.bfloat16, out_dtype=jnp.float32):
    """ft, neighbor: (N, in_features) f32. params: dict of weights (PyTorch layout).

    block_rows:    max row-tile size (rounded to a multiple of 8).
    compute_dtype: dtype of the MXU operands (weights + in-kernel activation
                   cast); the epilogue (residual, normalize) is always f32.
    out_dtype:     output dtype (bf16 halves output HBM traffic if tolerated).
    """
    n, d_in = ft.shape
    assert d_in % 128 == 0, "feature axis must stay lane-dense (multiple of 128)"

    # ---- fold the bias-free Linear pairs host-side (d_in x d_in each) and
    #      fuse gamma/beta along the output axis -> two (d_in, 2*d_in) weights.
    f32 = jnp.float32
    wg_ft = params["gamma1_1"].T.astype(f32) @ params["gamma1_2"].T.astype(f32)
    wg_nb = params["gamma2_1"].T.astype(f32) @ params["gamma2_2"].T.astype(f32)
    wb_ft = params["beta1_1"].T.astype(f32) @ params["beta1_2"].T.astype(f32)
    wb_nb = params["beta2_1"].T.astype(f32) @ params["beta2_2"].T.astype(f32)
    w_ft = jnp.concatenate([wg_ft, wb_ft], axis=1).astype(compute_dtype)   # (d_in, 2*d_in)
    w_nb = jnp.concatenate([wg_nb, wb_nb], axis=1).astype(compute_dtype)   # (d_in, 2*d_in)
    r = params["r"].astype(f32)                                            # (1, d_in)

    ft = ft.astype(f32)          # no-op for f32 inputs; activations stay f32 in HBM
    neighbor = neighbor.astype(f32)

    # ---- row tiling: multiple of 8, no host padding (cdiv grid, partial last
    #      block handled by Pallas), and >= 2 grid steps when possible so both
    #      v7x TensorCores get work.
    tm = max(8, min(_round_up(int(block_rows), 8), _round_up(pl.cdiv(n, 2), 8)))
    grid = (pl.cdiv(n, tm),)

    row_spec = pl.BlockSpec((tm, d_in), lambda i: (i, 0))
    # Constant index_map -> single-buffer the VMEM-resident operands.
    w_spec = pl.BlockSpec((d_in, 2 * d_in), lambda i: (0, 0),
                          pipeline_mode=pl.Buffered(1))
    r_spec = pl.BlockSpec((1, d_in), lambda i: (0, 0),
                          pipeline_mode=pl.Buffered(1))

    cbytes = jnp.dtype(compute_dtype).itemsize
    obytes = jnp.dtype(out_dtype).itemsize

    # VMEM budget from tile sizes (+25% and a couple MiB of Mosaic headroom).
    need = (2 * 2 * tm * d_in * 4                 # ft + nb tiles, double-buffered, f32
            + 2 * tm * d_in * obytes              # out tile, double-buffered
            + 2 * d_in * (2 * d_in) * cbytes      # both folded weights, single-buffered
            + 128 * 4                             # r
            + tm * (2 * d_in) * 4                 # f32 `pre`
            + 2 * tm * d_in * 4)                  # m / misc intermediates
    vmem_limit = int(min(max(need * 5 // 4 + (2 << 20), 32 << 20), 100 << 20))

    cost = pl.CostEstimate(
        flops=2 * 2 * n * d_in * (2 * d_in),                      # two (n,d)x(d,2d) matmuls
        transcendentals=n,                                        # one rsqrt per row
        bytes_accessed=(2 * n * d_in * 4                          # ft + nb reads
                        + n * d_in * obytes                       # out write
                        + 2 * d_in * (2 * d_in) * cbytes          # weights
                        + d_in * 4),                              # r
    )

    out = pl.pallas_call(
        relationv2_kernel,
        out_shape=jax.ShapeDtypeStruct((n, d_in), out_dtype),
        grid=grid,
        in_specs=[row_spec, row_spec, w_spec, w_spec, r_spec],
        out_specs=row_spec,
        compiler_params=pltpu.CompilerParams(
            dimension_semantics=("parallel",),
            vmem_limit_bytes=vmem_limit,
        ),
        cost_estimate=cost,
    )(ft, neighbor, w_ft, w_nb, r)

    return out


def init_params(key, in_features, out_features):
    ks = jax.random.split(key, 9)
    stdv_lin = 1.0 / jnp.sqrt(jnp.float32(in_features))
    stdv_lin2 = 1.0 / jnp.sqrt(jnp.float32(out_features))

    def u(k, shape, s):
        return jax.random.uniform(k, shape, jnp.float32, -s, s)

    return {
        # PyTorch nn.Linear weight layout: (out_features_of_layer, in_features_of_layer)
        "gamma1_1": u(ks[0], (out_features, in_features), stdv_lin),
        "gamma1_2": u(ks[1], (in_features, out_features), stdv_lin2),
        "gamma2_1": u(ks[2], (out_features, in_features), stdv_lin),
        "gamma2_2": u(ks[3], (in_features, out_features), stdv_lin2),
        "beta1_1":  u(ks[4], (out_features, in_features), stdv_lin),
        "beta1_2":  u(ks[5], (in_features, out_features), stdv_lin2),
        "beta2_1":  u(ks[6], (out_features, in_features), stdv_lin),
        "beta2_2":  u(ks[7], (in_features, out_features), stdv_lin2),
        "r":        u(ks[8], (1, in_features), 1.0 / jnp.sqrt(jnp.float32(in_features))),
    }


def _reference(ft, nb, p):
    """Pure-JAX replica of the PyTorch forward (two-stage Linears, no folding)."""
    def lin(x, w):  # PyTorch Linear, no bias
        return x @ w.T
    lrelu = lambda x: jnp.where(x > 0, x, 0.2 * x)
    gamma = lrelu(lin(lin(ft, p["gamma1_1"]), p["gamma1_2"])
                  + lin(lin(nb, p["gamma2_1"]), p["gamma2_2"])) + 1.0
    beta = lrelu(lin(lin(ft, p["beta1_1"]), p["beta1_2"])
                 + lin(lin(nb, p["beta2_1"]), p["beta2_2"]))
    m = ft + (gamma * p["r"] + beta) - nb
    norm = jnp.sqrt(jnp.sum(m * m, axis=1, keepdims=True))
    return m / jnp.maximum(norm, 1e-12)


if __name__ == "__main__":
    N, IN_F, OUT_F = 256, 128, 64   # small, tile-friendly shapes

    key = jax.random.PRNGKey(0)
    k_ft, k_nb, k_p = jax.random.split(key, 3)
    ft = jax.random.normal(k_ft, (N, IN_F), jnp.float32)
    neighbor = jax.random.normal(k_nb, (N, IN_F), jnp.float32)
    params = init_params(k_p, IN_F, OUT_F)

    ref = _reference(ft, neighbor, params)

    # f32 MXU path; block_rows > N/2 so the >=2-step cap kicks in (grid=(2,)).
    out = relationv2(ft, neighbor, params, block_rows=512,
                     compute_dtype=jnp.float32)
    jax.block_until_ready(out)
    assert out.shape == (N, IN_F)
    # Host-side weight folding re-associates the matmuls -> ~1e-6 level diffs.
    assert jnp.allclose(out, ref, atol=1e-4, rtol=1e-4)

    # Default bf16 MXU path (activations cast in-kernel; epilogue exact f32).
    out_bf16 = relationv2(ft, neighbor, params, block_rows=128)
    jax.block_until_ready(out_bf16)
    assert jnp.allclose(out_bf16, ref, atol=3e-2, rtol=3e-2)

    # Ragged N (not a multiple of the row tile): exercises the partial last
    # block handled by the cdiv grid — no host-side padding pass.
    N2 = 250
    out_r = relationv2(ft[:N2], neighbor[:N2], params, block_rows=512,
                       compute_dtype=jnp.float32)
    jax.block_until_ready(out_r)
    assert out_r.shape == (N2, IN_F)
    assert jnp.allclose(out_r, ref[:N2], atol=1e-4, rtol=1e-4)

    print("KERNEL_OK")
</pallas_src>

<mosaic_0001>
module attributes {stable_mosaic.version = 11 : i64} {
  func.func @relationv2_kernel(%arg0: i32, %arg1: memref<128x128xf32, #tpu.memory_space<vmem>>, %arg2: memref<128x128xf32, #tpu.memory_space<vmem>>, %arg3: memref<128x256xf32, #tpu.memory_space<vmem>>, %arg4: memref<128x256xf32, #tpu.memory_space<vmem>>, %arg5: memref<1x128xf32, #tpu.memory_space<vmem>>, %arg6: memref<128x128xf32, #tpu.memory_space<vmem>>) attributes {dimension_semantics = [#tpu.dimension_semantics<parallel>], iteration_bounds = array<i64: 2>, scalar_prefetch = 0 : i64, scratch_operands = 0 : i64, tpu.core_type = #tpu.core_type<tc>, window_params = [{transform_indices = @transform_0, window_bounds = array<i64: 128, 128>}, {transform_indices = @transform_1, window_bounds = array<i64: 128, 128>}, {pipeline_mode = #tpu.pipeline_mode<synchronous>, transform_indices = @transform_2, window_bounds = array<i64: 128, 256>}, {pipeline_mode = #tpu.pipeline_mode<synchronous>, transform_indices = @transform_3, window_bounds = array<i64: 128, 256>}, {pipeline_mode = #tpu.pipeline_mode<synchronous>, transform_indices = @transform_4, window_bounds = array<i64: 1, 128>}, {transform_indices = @transform_5, window_bounds = array<i64: 128, 128>}]} {
    %c0 = arith.constant 0 : index
    %c0_0 = arith.constant 0 : index
    %0 = vector.load %arg1[%c0, %c0_0] : memref<128x128xf32, #tpu.memory_space<vmem>>, vector<128x128xf32>
    %c0_1 = arith.constant 0 : index
    %c0_2 = arith.constant 0 : index
    %1 = vector.load %arg2[%c0_1, %c0_2] : memref<128x128xf32, #tpu.memory_space<vmem>>, vector<128x128xf32>
    %c0_3 = arith.constant 0 : index
    %c0_4 = arith.constant 0 : index
    %2 = vector.load %arg3[%c0_3, %c0_4] : memref<128x256xf32, #tpu.memory_space<vmem>>, vector<128x256xf32>
    %cst = arith.constant dense<0.000000e+00> : vector<128x256xf32>
    %3 = tpu.matmul %0, %2, %cst {dimension_numbers = #tpu.dot_dimension_numbers<[1], [0], [0], [1], [0, 0, 1, 1], [], []>} : vector<128x128xf32>, vector<128x256xf32>, vector<128x256xf32> -> vector<128x256xf32>
    %c0_5 = arith.constant 0 : index
    %c0_6 = arith.constant 0 : index
    %4 = vector.load %arg4[%c0_5, %c0_6] : memref<128x256xf32, #tpu.memory_space<vmem>>, vector<128x256xf32>
    %cst_7 = arith.constant dense<0.000000e+00> : vector<128x256xf32>
    %5 = tpu.matmul %1, %4, %cst_7 {dimension_numbers = #tpu.dot_dimension_numbers<[1], [0], [0], [1], [0, 0, 1, 1], [], []>} : vector<128x128xf32>, vector<128x256xf32>, vector<128x256xf32> -> vector<128x256xf32>
    %6 = arith.addf %3, %5 : vector<128x256xf32>
    %7 = vector.extract_strided_slice %6 {offsets = [0, 0], sizes = [128, 128], strides = [1, 1]} : vector<128x256xf32> to vector<128x128xf32>
    %8 = vector.extract_strided_slice %6 {offsets = [0, 128], sizes = [128, 128], strides = [1, 1]} : vector<128x256xf32> to vector<128x128xf32>
    %cst_8 = arith.constant 2.000000e-01 : f32
    %9 = vector.broadcast %cst_8 : f32 to vector<128x128xf32>
    %10 = arith.mulf %9, %7 : vector<128x128xf32>
    %11 = arith.maximumf %7, %10 : vector<128x128xf32>
    %cst_9 = arith.constant 1.000000e+00 : f32
    %12 = vector.broadcast %cst_9 : f32 to vector<128x128xf32>
    %13 = arith.addf %11, %12 : vector<128x128xf32>
    %cst_10 = arith.constant 2.000000e-01 : f32
    %14 = vector.broadcast %cst_10 : f32 to vector<128x128xf32>
    %15 = arith.mulf %14, %8 : vector<128x128xf32>
    %16 = arith.maximumf %8, %15 : vector<128x128xf32>
    %c0_11 = arith.constant 0 : index
    %c0_12 = arith.constant 0 : index
    %17 = vector.load %arg5[%c0_11, %c0_12] : memref<1x128xf32, #tpu.memory_space<vmem>>, vector<1x128xf32>
    %18 = vector.broadcast %17 : vector<1x128xf32> to vector<128x128xf32>
    %19 = arith.mulf %13, %18 : vector<128x128xf32>
    %20 = arith.addf %19, %16 : vector<128x128xf32>
    %21 = arith.addf %0, %20 : vector<128x128xf32>
    %22 = arith.subf %21, %1 : vector<128x128xf32>
    %23 = arith.mulf %22, %22 : vector<128x128xf32>
    %cst_13 = arith.constant dense<0.000000e+00> : vector<128xf32>
    %24 = vector.multi_reduction <add>, %23, %cst_13 [1] : vector<128x128xf32> to vector<128xf32>
    %25 = vector.shape_cast %24 : vector<128xf32> to vector<128x1xf32>
    %cst_14 = arith.constant 1.000000e-24 : f32
    %26 = vector.broadcast %cst_14 : f32 to vector<128x1xf32>
    %27 = arith.maximumf %25, %26 : vector<128x1xf32>
    %28 = math.rsqrt %27 : vector<128x1xf32>
    %29 = vector.broadcast %28 : vector<128x1xf32> to vector<128x128xf32>
    %30 = arith.mulf %22, %29 : vector<128x128xf32>
    %c0_15 = arith.constant 0 : index
    %c0_16 = arith.constant 0 : index
    %31 = vector.load %arg6[%c0_15, %c0_16] : memref<128x128xf32, #tpu.memory_space<vmem>>, vector<128x128xf32>
    tpu.vector_store %arg6[%c0_15, %c0_16], %30 {strides = array<i32>} : memref<128x128xf32, #tpu.memory_space<vmem>>, vector<128x128xf32>,
    return
  }
  func.func @transform_0(%arg0: i32) -> (i32, i32) {
    %c0_i32 = arith.constant 0 : i32
    %c0_i32_0 = arith.constant 0 : i32
    return %arg0, %c0_i32 : i32, i32
  }
  func.func @transform_1(%arg0: i32) -> (i32, i32) {
    %c0_i32 = arith.constant 0 : i32
    %c0_i32_0 = arith.constant 0 : i32
    return %arg0, %c0_i32 : i32, i32
  }
  func.func @transform_2(%arg0: i32) -> (i32, i32) {
    %c0_i32 = arith.constant 0 : i32
    %c0_i32_0 = arith.constant 0 : i32
    %c0_i32_1 = arith.constant 0 : i32
    return %c0_i32, %c0_i32_0 : i32, i32
  }
  func.func @transform_3(%arg0: i32) -> (i32, i32) {
    %c0_i32 = arith.constant 0 : i32
    %c0_i32_0 = arith.constant 0 : i32
    %c0_i32_1 = arith.constant 0 : i32
    return %c0_i32, %c0_i32_0 : i32, i32
  }
  func.func @transform_4(%arg0: i32) -> (i32, i32) {
    %c0_i32 = arith.constant 0 : i32
    %c0_i32_0 = arith.constant 0 : i32
    %c0_i32_1 = arith.constant 0 : i32
    return %c0_i32, %c0_i32_0 : i32, i32
  }
  func.func @transform_5(%arg0: i32) -> (i32, i32) {
    %c0_i32 = arith.constant 0 : i32
    %c0_i32_0 = arith.constant 0 : i32
    return %arg0, %c0_i32 : i32, i32
  }
}

</mosaic_0001>

<bundles_post_ra>
// kernel: tpu_custom_call.1
= control target key start
LH: loop header
LB: loop body
LE: loop exit
PB: predicated region body
PF: predicated region fallthrough
CT: control target
= control target key end

     0   :  { %s2085_s0 = inlined_call_operand.hbm [shape: f32[256,128], index: 0, kind: input, shape index: {}]   ;;  %s2086_s1 = inlined_call_operand.hbm [shape: f32[256,128], index: 1, kind: input, shape index: {}]   ;;  %s2087_s2 = inlined_call_operand.hbm [shape: f32[128,256], index: 2, kind: input, shape index: {}]   ;;  %s2088_s3 = inlined_call_operand.hbm [shape: f32[128,256], index: 3, kind: input, shape index: {}]   ;;  %s2089_s4 = inlined_call_operand.vmem [shape: f32[1,128], index: 4, kind: input, shape index: {}]   ;;  %s2090_s5 = inlined_call_operand.hbm [shape: f32[256,128], index: 5, kind: output, shape index: {}]  }
   0x1   :  { %2092 = sst [smem:[#allocation17_spill]] %s2085_s0 }
   0x2   :  { %2093 = sst [smem:[#allocation18_spill]] %s2087_s2 }
   0x3   :  { %2094 = sst [smem:[#allocation19_spill]] %s2088_s3 }
   0x4   :  { %10 = vsyncpa [#allocation3], 0 }
   0x5   :  { %12 = vsyncpa [#allocation3 + $0x1], 0 }
   0x6   :  { %13 = vsyncpa [#allocation6], 0 }
   0x7   :  { %15 = vsyncpa [#allocation6 + $0x1], 0 }
   0x8   :  { %16 = vsyncpa [#allocation9], 0 }
   0x9   :  { %17 = vsyncpa [#allocation4], 0 }
   0xa   :  { %19 = vsyncpa [#allocation4 + $0x1], 0  ;;  %s1588_s18 = smov 0   ;;  %s1590_s19 = smov 0  }
   0xb   :  { %s1592_s20 = smov 0   ;;  %s1594_s21 = smov 0  }
   0xc LB: > { %s1609_s22 = sadd.s32 4294967295, %s1548_s21   ;;  %s1214_s23 = sadd.s32 4294967294, %s1548_s21   ;;  %s1548_s21 = sphi %s1594_s21, %s2110_s21   ;;  %s1544_s20 = sphi %s1592_s20, %s2109_s20   ;;  %s1540_s19 = sphi %s1590_s19, %s2108_s19   ;;  %s1536_s18 = sphi %s1588_s18, %s2107_s18  }
   0xd   : > { %p45_p0 = scmp.ne.s32.totalorder %s1540_s19, %s1536_s18  ;;  %p46_p1 = scmp.eq.s32.totalorder %s1609_s22, 0 }
   0xe   : > { %p158_p2 = scmp.eq.s32.totalorder %s1609_s22, 1  ;;  %p164_p3 = scmp.eq.s32.totalorder %s1214_s23, 1 }
   0xf   : > { %p1618_p4 = por %p46_p1, %p45_p0  ;;  %p1215_p5 = scmp.ge.s32.totalorder %s1548_s21, 1 }
  0x10   : > { %p1623_p6 = por %p164_p3, %p45_p0  ;;  %p171_p7 = scmp.lt.s32.totalorder %s1548_s21, 3 }
  0x11   : > { %s2097_s2 = sld [smem:[#allocation18_spill]]  ;;  %s1550_s30 = smov [#allocation7]  }
  0x12   : > { %p1631_p8 = pnand %p1215_p5, %p171_p7  ;;  %s184_s6 = sshll.u32 %s1550_s30, 4  ;;  %s185_s6 = int_to_ptr.vmem [resolvable:$true] %s184_s6 }
  0x13   : > { %s2099_s3 = sld [smem:[#allocation19_spill]]  ;;  %s1551_s10 = smov 256  }
  0x14   : > { %p1253_p9 = pneg %p1631_p8  ;;  %s1552_s11 = smov 16  }
  0x15   : > { %s1553_s12 = smov [#allocation8]   ;;  %s1644_s14 = sadd.s32 1, %s1548_s21  }
  0x16   : > { %p1254_p10 = pnand %p1253_p9, %p46_p1  ;;  %s198_s13 = sshll.u32 %s1553_s12, 4  ;;  %s199_s13 = int_to_ptr.vmem [resolvable:$true] %s198_s13 }
  0x17   : > { %s182_s28 = sshll.u32 %s2097_s2, 4  ;;  %s32_s15 = sadd.s32 1, %s1544_s20  ;;  %s183_s28 = int_to_ptr.hbm [resolvable:$true] %s182_s28 }
  0x18   : > { %1256 = dma.hbm_to_vmem [thread:$0]  (!%p1254_p10), %s183_s28, 4096, %s185_s6, [#allocation6], %s1551_s10, %s1551_s10, %s1552_s11  }
  0x19   : > { %s196_s9 = sshll.u32 %s2099_s3, 4  ;;  %s29_s16 = ssub.s32 %s1548_s21, %s1644_s14  ;;  %s197_s9 = int_to_ptr.hbm [resolvable:$true] %s196_s9 }
  0x1a   : > { %1259 = dma.hbm_to_vmem [thread:$0]  (!%p1254_p10), %s197_s9, 4096, %s199_s13, [#allocation9], %s1551_s10, %s1551_s10, %s1552_s11  }
  0x1b   : > { %p39_p12 = scmp.ne.s32.totalorder %s1544_s20, %s1540_s19  ;;  %p30_p13 = scmp.eq.s32.totalorder %s29_s16, 0 }
  0x1c   : > { %p40_p0 = scmp.eq.s32.totalorder %s1548_s21, 0  ;;  %p1273_p5 = scmp.lt.s32.totalorder %s1548_s21, 2 }
  0x1d   : > { %p1654_p3 = por %p158_p2, %p39_p12  ;;  %s215_s26 = sand.u32 1, %s1544_s20  }
  0x1e   : > { %s1660_s23 = scalar_select %p30_p13, %s1544_s20, %s32_s15  }
  0x1f   : > { %p41_p7 = por %p40_p0, %p39_p12  ;;  %s1663_s27 = sshll.u32 %s215_s26, 7 }
  0x20   : > { %2101 = sst [smem:[#allocation16_spill]] %s1660_s23  ;;  %s2091_s28 = sshll.u32 %s1548_s21, 7 }
  0x21   : > { %s2102_s0 = sld [smem:[#allocation17_spill]]  ;;  %s219_s8 = scalar_lea.vmem [#allocation2], %s1663_s27 }
  0x22   : > { %s227_s9 = sshll.u32 %s219_s8, 4  ;;  %p1672_p2 = pnand %p1273_p5, %p41_p7  ;;  %s228_s9 = int_to_ptr.vmem [resolvable:$true] %s227_s9 }
  0x23   : > { %s216_s12 = scalar_lea.sflag [#allocation3], %s215_s26 }
  0x24   : > { %p1414_p10 = pneg %p1672_p2 }
  0x27   : > { %s224_s7 = scalar_lea.hbm %s2102_s0, %s2091_s28  ;;  %s1417_s6 = scalar_lea.hbm %s2102_s0, 256 }
  0x28   : > { %s225_s10 = sshll.u32 %s224_s7, 4  ;;  %s226_s10 = int_to_ptr.hbm [resolvable:$true] %s225_s10 }
  0x29   : > { %s1410_s13 = sshra.s32 %s226_s10, 4  ;;  %s1411_s13 = int_to_ptr.hbm [resolvable:$true] %s1410_s13 }
  0x2a   : > { %s1412_s15 = scalar_lea.hbm %s1411_s13, 128  ;;  %p1418_p0 = scmp.lt.s32.totalorder %s1411_s13, %s2102_s0 }
  0x2b   : > { %p1413_p9 = scmp.ne.s32.totalorder %s1411_s13, %s1412_s15  ;;  %p1419_p5 = scmp.lt.s32.totalorder %s1417_s6, %s1412_s15 }
  0x2d   : > { %p1415_p12 = pnand %p1414_p10, %p1413_p9  ;;  %p1420_p7 = por %p1419_p5, %p1418_p0 }
  0x2f   : > { %p1416_p13 = pneg %p1415_p12 }
  0x31   : > { %p1421_p11 = pnand %p1420_p7, %p1416_p13 }
  0x33   : > { %1424 = shalt.err (!%p1421_p11)
}
  0x34   : > { %s1554_s26 = smov 128   ;;  %s1555_s28 = smov 8  }
  0x35   : > { %1263 = dma.hbm_to_vmem [thread:$0]  (!%p1672_p2), %s226_s10, 2048, %s228_s9, %s216_s12, %s1554_s26, %s1554_s26, %s1555_s28  }
  0x36   : > { %s2104_s2 = sshll.u32 %s1548_s21, 7  ;;  %s241_s7 = scalar_lea.vmem [#allocation5], %s1663_s27 }
  0x37   : > { %s246_s3 = scalar_lea.hbm %s2086_s1, %s2104_s2  ;;  %s249_s13 = sshll.u32 %s241_s7, 4  ;;  %s250_s13 = int_to_ptr.vmem [resolvable:$true] %s249_s13 }
  0x38   : > { %s247_s15 = sshll.u32 %s246_s3, 4  ;;  %s237_s6 = sand.u32 1, %s1548_s21   ;;  %s248_s15 = int_to_ptr.hbm [resolvable:$true] %s247_s15 }
  0x39   : > { %s238_s8 = scalar_lea.sflag [#allocation6], %s237_s6  ;;  %s1440_s0 = sshra.s32 %s248_s15, 4  ;;  %s1441_s0 = int_to_ptr.hbm [resolvable:$true] %s1440_s0 }
  0x3a   : > { %s1442_s23 = scalar_lea.hbm %s1441_s0, 128  ;;  %s1447_s12 = scalar_lea.hbm %s2086_s1, 256 }
  0x3b   : > { %p1443_p11 = scmp.ne.s32.totalorder %s1441_s0, %s1442_s23  ;;  %p1448_p13 = scmp.lt.s32.totalorder %s1441_s0, %s2086_s1 }
  0x3c   : > { %p1449_p0 = scmp.lt.s32.totalorder %s1447_s12, %s1442_s23 }
  0x3d   : > { %p1445_p9 = pnand %p1443_p11, %p1414_p10 }
  0x3e   : > { %p1450_p5 = por %p1449_p0, %p1448_p13 }
  0x3f   : > { %p1446_p12 = pneg %p1445_p9 }
  0x41   : > { %p1451_p7 = pnand %p1450_p5, %p1446_p12 }
  0x43   : > { %1454 = shalt.err (!%p1451_p7)
}
  0x44   : > { %1266 = dma.hbm_to_vmem [thread:$0]  (!%p1672_p2), %s248_s15, 2048, %s250_s13, %s238_s8, %s1554_s26, %s1554_s26, %s1555_s28  }
  0x45   : > { %261 = sbr.rel (%p1631_p8) target bundleno = 526 (0x20e), region = 40  ;;  %s1710_s3 = sand.u32 (!%p1631_p8), 1, %s1540_s19  }
  0x46   : > { %s1713_s16 = sshll.u32 (!%p1631_p8), %s1710_s3, 7  ;;  %s264_s0 = scalar_lea.sflag (!%p1631_p8), [#allocation3], %s1710_s3 }
  0x47   : > { %s1717_s23 = scalar_lea.vmem (!%p1631_p8), [#allocation2], %s1713_s16 }
  0x4a   : > { %1515 = dma.done.wait (%p1618_p4), %s264_s0, 2048  }
  0x4b   : > { %1517 = vsyncadd (%p1618_p4), %s264_s0, 4294965248  ;;  %s273_s29 = sand.u32 1, %s1609_s22   ;;  %s1725_s11 = scalar_lea.vmem [#allocation5], %s1713_s16 }
  0x4c   : > { %s274_s28 = scalar_lea.sflag [#allocation6], %s273_s29 }
  0x4d   : > { %1519 = dma.done.wait (%p1618_p4), %s274_s28, 2048  }
  0x4e   : > { %1521 = vsyncadd (%p1618_p4), %s274_s28, 4294965248 }
  0x4f   : > { %1523 = dma.done.wait (%p46_p1), [#allocation6], 4096  }
  0x50   : > { %1525 = vsyncadd (%p46_p1), [#allocation6], 4294963200 }
  0x51   : > { %1527 = dma.done.wait (%p46_p1), [#allocation9], 4096  }
  0x52   : > { %1529 = vsyncadd (%p46_p1), [#allocation9], 4294963200  ;;  %v385_v0 = vld [vmem:[#allocation7 + $0xf0] sm:$0xff]  ;;  %v383_v1 = vld [vmem:[#allocation7 + $0xe0] sm:$0xff]  ;;  %s2018_s30 = scalar_lea.vmem [#allocation10], %s1713_s16  ;;  %s1238_s7 = sshll.u32 %s1609_s22, 7 }
  0x53   : > { %v386_v2 = vld [vmem:[#allocation7 + $0xf8] sm:$0xff]  ;;  %549 = vmatpush.msra.mxu2 %v385_v0  ;;  %v384_v3 = vld [vmem:[#allocation7 + $0xe8] sm:$0xff]  ;;  %v417_v4 = vld [vmem:[#allocation8 + $0xf0] sm:$0xff]  ;;  %s1095_s6 = scalar_lea.hbm %s2090_s5, %s1238_s7  ;;  %s1096_s8 = sshll.u32 %s2018_s30, 4  ;;  %s1097_s8 = int_to_ptr.vmem [resolvable:$true] %s1096_s8 }
  0x54   : > { %614 = vmatpush.msra.mxu3 %v386_v2  ;;  %v381_v5 = vld [vmem:[#allocation7 + $0xd0] sm:$0xff]  ;;  %419 = vmatpush.msra.mxu0 %v417_v4  ;;  %v382_v6 = vld [vmem:[#allocation7 + $0xd8] sm:$0xff]  ;;  %v415_v7 = vld [vmem:[#allocation8 + $0xe0] sm:$0xff]  ;;  %s1098_s9 = sshll.u32 %s1095_s6, 4  ;;  %s1084_s22 = scalar_lea.sflag [#allocation4], %s1710_s3  ;;  %s1099_s9 = int_to_ptr.hbm [resolvable:$true] %s1098_s9 }
  0x55   : > { %550 = vmatpush.msra.mxu2 %v383_v1  ;;  %v379_v8 = vld [vmem:[#allocation7 + $0xc0] sm:$0xff]  ;;  %v418_v9 = vld [vmem:[#allocation8 + $0xf8] sm:$0xff]  ;;  %v380_v10 = vld [vmem:[#allocation7 + $0xc8] sm:$0xff]  ;;  %s1484_s10 = sshra.s32 %s1099_s9, 4  ;;  %s1490_s16 = scalar_lea.hbm %s2090_s5, 256  ;;  %s1485_s10 = int_to_ptr.hbm [resolvable:$true] %s1484_s10 }
  0x56   : > { %615 = vmatpush.msra.mxu3 %v384_v3  ;;  %420 = vmatpush.msra.mxu0 %v415_v7  ;;  %v413_v11 = vld [vmem:[#allocation8 + $0xd0] sm:$0xff]  ;;  %v416_v12 = vld [vmem:[#allocation8 + $0xe8] sm:$0xff]  ;;  %v411_v13 = vld [vmem:[#allocation8 + $0xc0] sm:$0xff]  ;;  %s1486_s12 = scalar_lea.hbm %s1485_s10, 128  ;;  %p1491_p2 = scmp.lt.s32.totalorder %s1485_s10, %s2090_s5 }
  0x57   : > { %484 = vmatpush.msra.mxu1 %v418_v9  ;;  %551 = vmatpush.msra.mxu2 %v381_v5  ;;  %v414_v14 = vld [vmem:[#allocation8 + $0xd8] sm:$0xff]  ;;  %v377_v15 = vld [vmem:[#allocation7 + $0xb0] sm:$0xff]  ;;  %v412_v18 = vld [vmem:[#allocation8 + $0xc8] sm:$0xff]  ;;  %p1487_p1 = scmp.ne.s32.totalorder %s1485_s10, %s1486_s12  ;;  %p1492_p10 = scmp.lt.s32.totalorder %s1490_s16, %s1486_s12 }
  0x58   : > { %616 = vmatpush.msra.mxu3 %v382_v6  ;;  %421 = vmatpush.msra.mxu0 %v413_v11  ;;  %v378_v16 = vld [vmem:[#allocation7 + $0xb8] sm:$0xff]  ;;  %v409_v17 = vld [vmem:[#allocation8 + $0xb0] sm:$0xff]  ;;  %v375_v19 = vld [vmem:[#allocation7 + $0xa0] sm:$0xff] }
  0x59   : > { %485 = vmatpush.msra.mxu1 %v416_v12  ;;  %552 = vmatpush.msra.mxu2 %v379_v8  ;;  %v376_v20 = vld [vmem:[#allocation7 + $0xa8] sm:$0xff]  ;;  %v407_v21 = vld [vmem:[#allocation8 + $0xa0] sm:$0xff]  ;;  %v410_v22 = vld [vmem:[#allocation8 + $0xb8] sm:$0xff]  ;;  %p1488_p4 = pnand %p1487_p1, %p1654_p3  ;;  %p1493_p11 = por %p1492_p10, %p1491_p2 }
  0x5a   : > { %617 = vmatpush.msra.mxu3 %v380_v10  ;;  %422 = vmatpush.msra.mxu0 %v411_v13  ;;  %v373_v23 = vld [vmem:[#allocation7 + $0x90] sm:$0xff]  ;;  %v374_v24 = vld [vmem:[#allocation7 + $0x98] sm:$0xff]  ;;  %v408_v26 = vld [vmem:[#allocation8 + $0xa8] sm:$0xff] }
  0x5b   : > { %486 = vmatpush.msra.mxu1 %v414_v14  ;;  %553 = vmatpush.msra.mxu2 %v377_v15  ;;  %v405_v25 = vld [vmem:[#allocation8 + $0x90] sm:$0xff]  ;;  %v371_v27 = vld [vmem:[#allocation7 + $0x80] sm:$0xff]  ;;  %v372_v28 = vld [vmem:[#allocation7 + $0x88] sm:$0xff]  ;;  %p1489_p8 = pneg %p1488_p4 }
  0x5c   : > { %618 = vmatpush.msra.mxu3 %v378_v16  ;;  %423 = vmatpush.msra.mxu0 %v409_v17  ;;  %v403_v29 = vld [vmem:[#allocation8 + $0x80] sm:$0xff]  ;;  %v406_v30 = vld [vmem:[#allocation8 + $0x98] sm:$0xff]  ;;  %v369_v31 = vld [vmem:[#allocation7 + $0x70] sm:$0xff] }
  0x5d   : > { %487 = vmatpush.msra.mxu1 %v412_v18  ;;  %554 = vmatpush.msra.mxu2 %v375_v19  ;;  %v370_v32 = vld [vmem:[#allocation7 + $0x78] sm:$0xff]  ;;  %v401_v33 = vld [vmem:[#allocation8 + $0x70] sm:$0xff]  ;;  %v404_v34 = vld [vmem:[#allocation8 + $0x88] sm:$0xff]  ;;  %p1494_p9 = pnand %p1493_p11, %p1489_p8 }
  0x5e   : > { %619 = vmatpush.msra.mxu3 %v376_v20  ;;  %424 = vmatpush.msra.mxu0 %v407_v21  ;;  %v367_v35 = vld [vmem:[#allocation7 + $0x60] sm:$0xff]  ;;  %v368_v36 = vld [vmem:[#allocation7 + $0x68] sm:$0xff]  ;;  %v402_v38 = vld [vmem:[#allocation8 + $0x78] sm:$0xff] }
  0x5f   : > { %488 = vmatpush.msra.mxu1 %v410_v22  ;;  %555 = vmatpush.msra.mxu2 %v373_v23  ;;  %v399_v37 = vld [vmem:[#allocation8 + $0x60] sm:$0xff]  ;;  %v365_v39 = vld [vmem:[#allocation7 + $0x50] sm:$0xff]  ;;  %v366_v40 = vld [vmem:[#allocation7 + $0x58] sm:$0xff] }
  0x60   : > { %620 = vmatpush.msra.mxu3 %v374_v24  ;;  %425 = vmatpush.msra.mxu0 %v405_v25  ;;  %v397_v41 = vld [vmem:[#allocation8 + $0x50] sm:$0xff]  ;;  %v400_v42 = vld [vmem:[#allocation8 + $0x68] sm:$0xff]  ;;  %v363_v43 = vld [vmem:[#allocation7 + $0x40] sm:$0xff] }
  0x61   : > { %489 = vmatpush.msra.mxu1 %v408_v26  ;;  %556 = vmatpush.msra.mxu2 %v371_v27  ;;  %v364_v44 = vld [vmem:[#allocation7 + $0x48] sm:$0xff]  ;;  %v395_v45 = vld [vmem:[#allocation8 + $0x40] sm:$0xff]  ;;  %v398_v46 = vld [vmem:[#allocation8 + $0x58] sm:$0xff] }
  0x62   : > { %621 = vmatpush.msra.mxu3 %v372_v28  ;;  %426 = vmatpush.msra.mxu0 %v403_v29  ;;  %v361_v47 = vld [vmem:[#allocation7 + $0x30] sm:$0xff]  ;;  %v362_v48 = vld [vmem:[#allocation7 + $0x38] sm:$0xff]  ;;  %v396_v50 = vld [vmem:[#allocation8 + $0x48] sm:$0xff] }
  0x63   : > { %490 = vmatpush.msra.mxu1 %v406_v30  ;;  %557 = vmatpush.msra.mxu2 %v369_v31  ;;  %v393_v49 = vld [vmem:[#allocation8 + $0x30] sm:$0xff]  ;;  %v359_v51 = vld [vmem:[#allocation7 + $0x20] sm:$0xff]  ;;  %v360_v52 = vld [vmem:[#allocation7 + $0x28] sm:$0xff] }
  0x64   : > { %622 = vmatpush.msra.mxu3 %v370_v32  ;;  %427 = vmatpush.msra.mxu0 %v401_v33  ;;  %v391_v53 = vld [vmem:[#allocation8 + $0x20] sm:$0xff]  ;;  %v394_v54 = vld [vmem:[#allocation8 + $0x38] sm:$0xff]  ;;  %v357_v55 = vld [vmem:[#allocation7 + $0x10] sm:$0xff] }
  0x65   : > { %491 = vmatpush.msra.mxu1 %v404_v34  ;;  %558 = vmatpush.msra.mxu2 %v367_v35  ;;  %v358_v56 = vld [vmem:[#allocation7 + $0x18] sm:$0xff]  ;;  %v389_v57 = vld [vmem:[#allocation8 + $0x10] sm:$0xff]  ;;  %v392_v58 = vld [vmem:[#allocation8 + $0x28] sm:$0xff] }
  0x66   : > { %623 = vmatpush.msra.mxu3 %v368_v36  ;;  %428 = vmatpush.msra.mxu0 %v399_v37  ;;  %v355_v59 = vld [vmem:[#allocation7] sm:$0xff]  ;;  %v356_v60 = vld [vmem:[#allocation7 + $0x8] sm:$0xff]  ;;  %v390_v63 = vld [vmem:[#allocation8 + $0x18] sm:$0xff] }
  0x67   : > { %492 = vmatpush.msra.mxu1 %v402_v38  ;;  %559 = vmatpush.msra.mxu2 %v365_v39  ;;  %v1740_v61 = vld [vmem:[%s1717_s23] sm:$0xff]  ;;  %v388_v1 = vld [vmem:[#allocation8 + $0x8] sm:$0xff]  ;;  %v1760_v4 = vld [vmem:[%s1717_s23 + $0x10] sm:$0xff] }
  0x68   : > { %624 = vmatpush.msra.mxu3 %v366_v40  ;;  %429 = vmatpush.msra.mxu0 %v397_v41  ;;  %v387_v62 = vld [vmem:[#allocation8] sm:$0xff]  ;;  %v1750_v2 = vld [vmem:[%s1717_s23 + $0x8] sm:$0xff]  ;;  %v1763_v5 = vld [vmem:[%s1725_s11 + $0x10] sm:$0xff] }
  0x69   : > { %493 = vmatpush.msra.mxu1 %v400_v42  ;;  %560 = vmatpush.msra.mxu2 %v363_v43  ;;  %v1743_v0 = vld [vmem:[%s1725_s11] sm:$0xff]  ;;  %v1753_v3 = vld [vmem:[%s1725_s11 + $0x8] sm:$0xff]  ;;  %v1770_v6 = vld [vmem:[%s1717_s23 + $0x18] sm:$0xff] }
  0x6a   : > { %625 = vmatpush.msra.mxu3 %v364_v44  ;;  %430 = vmatpush.msra.mxu0 %v395_v45  ;;  %v1773_v7 = vld [vmem:[%s1725_s11 + $0x18] sm:$0xff]  ;;  %v1780_v8 = vld [vmem:[%s1717_s23 + $0x20] sm:$0xff]  ;;  %v1790_v10 = vld [vmem:[%s1717_s23 + $0x28] sm:$0xff] }
  0x6b   : > { %494 = vmatpush.msra.mxu1 %v398_v46  ;;  %561 = vmatpush.msra.mxu2 %v361_v47  ;;  %v1783_v9 = vld [vmem:[%s1725_s11 + $0x20] sm:$0xff]  ;;  %v1793_v11 = vld [vmem:[%s1725_s11 + $0x28] sm:$0xff]  ;;  %v1800_v12 = vld [vmem:[%s1717_s23 + $0x30] sm:$0xff] }
  0x6c   : > { %626 = vmatpush.msra.mxu3 %v362_v48  ;;  %431 = vmatpush.msra.mxu0 %v393_v49  ;;  %v1803_v13 = vld [vmem:[%s1725_s11 + $0x30] sm:$0xff]  ;;  %v1810_v14 = vld [vmem:[%s1717_s23 + $0x38] sm:$0xff]  ;;  %v1820_v16 = vld [vmem:[%s1717_s23 + $0x40] sm:$0xff] }
  0x6d   : > { %495 = vmatpush.msra.mxu1 %v396_v50  ;;  %562 = vmatpush.msra.mxu2 %v359_v51  ;;  %v1813_v15 = vld [vmem:[%s1725_s11 + $0x38] sm:$0xff]  ;;  %v1823_v17 = vld [vmem:[%s1725_s11 + $0x40] sm:$0xff]  ;;  %v1830_v18 = vld [vmem:[%s1717_s23 + $0x48] sm:$0xff] }
  0x6e   : > { %627 = vmatpush.msra.mxu3 %v360_v52  ;;  %432 = vmatpush.msra.mxu0 %v391_v53  ;;  %v1833_v19 = vld [vmem:[%s1725_s11 + $0x48] sm:$0xff]  ;;  %v1840_v20 = vld [vmem:[%s1717_s23 + $0x50] sm:$0xff]  ;;  %v1850_v22 = vld [vmem:[%s1717_s23 + $0x58] sm:$0xff] }
  0x6f   : > { %496 = vmatpush.msra.mxu1 %v394_v54  ;;  %563 = vmatpush.msra.mxu2 %v357_v55  ;;  %v1843_v21 = vld [vmem:[%s1725_s11 + $0x50] sm:$0xff]  ;;  %v1853_v23 = vld [vmem:[%s1725_s11 + $0x58] sm:$0xff]  ;;  %v1860_v24 = vld [vmem:[%s1717_s23 + $0x60] sm:$0xff] }
  0x70   : > { %628 = vmatpush.msra.mxu3 %v358_v56  ;;  %433 = vmatpush.msra.mxu0 %v389_v57  ;;  %v1863_v25 = vld [vmem:[%s1725_s11 + $0x60] sm:$0xff]  ;;  %v1870_v26 = vld [vmem:[%s1717_s23 + $0x68] sm:$0xff]  ;;  %v1880_v28 = vld [vmem:[%s1717_s23 + $0x70] sm:$0xff] }
  0x71   : > { %497 = vmatpush.msra.mxu1 %v392_v58  ;;  %564 = vmatpush.msra.mxu2 %v355_v59  ;;  %v1873_v27 = vld [vmem:[%s1725_s11 + $0x68] sm:$0xff]  ;;  %v1883_v29 = vld [vmem:[%s1725_s11 + $0x70] sm:$0xff]  ;;  %v1890_v30 = vld [vmem:[%s1717_s23 + $0x78] sm:$0xff] }
  0x72   : > { %629 = vmatpush.msra.mxu3 %v356_v60  ;;  %565 = vmatmul.f32.vlgmr.msra.gmra.mxu2 %v1740_v61  ;;  %v1893_v31 = vld [vmem:[%s1725_s11 + $0x78] sm:$0xff]  ;;  %v1902_v41 = vld [vmem:[%s2089_s4] ss:$0 sm:$0xff] }
  0x73   : > { %630 = vmatmul.f32.vlgmr.msra.gmra.mxu3 %v1740_v61  ;;  %434 = vmatpush.msra.mxu0 %v387_v62 }
  0x74   : > { %498 = vmatpush.msra.mxu1 %v390_v63  ;;  %435 = vmatmul.f32.vlgmr.msra.gmra.mxu0 %v1743_v0 }
  0x76   : > { %499 = vmatpush.msra.mxu1 %v388_v1 }
  0x77   : > { %500 = vmatmul.f32.vlgmr.msra.gmra.mxu1 %v1743_v0 }
  0x7a   : > { %568 = vmatmul.f32.gmra.mxu2 %v1750_v2 }
  0x7b   : > { %633 = vmatmul.f32.gmra.mxu3 %v1750_v2 }
  0x7c   : > { %438 = vmatmul.f32.gmra.mxu0 %v1753_v3 }
  0x7f   : > { %503 = vmatmul.f32.gmra.mxu1 %v1753_v3 }
  0x82   : > { %571 = vmatmul.f32.gmra.mxu2 %v1760_v4 }
  0x83   : > { %636 = vmatmul.f32.gmra.mxu3 %v1760_v4 }
  0x84   : > { %441 = vmatmul.f32.gmra.mxu0 %v1763_v5 }
  0x87   : > { %506 = vmatmul.f32.gmra.mxu1 %v1763_v5 }
  0x8a   : > { %574 = vmatmul.f32.gmra.mxu2 %v1770_v6 }
  0x8b   : > { %639 = vmatmul.f32.gmra.mxu3 %v1770_v6 }
  0x8c   : > { %444 = vmatmul.f32.gmra.mxu0 %v1773_v7 }
  0x8f   : > { %509 = vmatmul.f32.gmra.mxu1 %v1773_v7 }
  0x92   : > { %577 = vmatmul.f32.gmra.mxu2 %v1780_v8 }
  0x93   : > { %642 = vmatmul.f32.gmra.mxu3 %v1780_v8 }
  0x94   : > { %447 = vmatmul.f32.gmra.mxu0 %v1783_v9 }
  0x97   : > { %512 = vmatmul.f32.gmra.mxu1 %v1783_v9 }
  0x9a   : > { %580 = vmatmul.f32.gmra.mxu2 %v1790_v10 }
  0x9b   : > { %645 = vmatmul.f32.gmra.mxu3 %v1790_v10 }
  0x9c   : > { %450 = vmatmul.f32.gmra.mxu0 %v1793_v11 }
  0x9f   : > { %515 = vmatmul.f32.gmra.mxu1 %v1793_v11 }
  0xa2   : > { %583 = vmatmul.f32.gmra.mxu2 %v1800_v12 }
  0xa3   : > { %648 = vmatmul.f32.gmra.mxu3 %v1800_v12 }
  0xa4   : > { %453 = vmatmul.f32.gmra.mxu0 %v1803_v13 }
  0xa7   : > { %518 = vmatmul.f32.gmra.mxu1 %v1803_v13 }
  0xaa   : > { %586 = vmatmul.f32.gmra.mxu2 %v1810_v14 }
  0xab   : > { %651 = vmatmul.f32.gmra.mxu3 %v1810_v14 }
  0xac   : > { %456 = vmatmul.f32.gmra.mxu0 %v1813_v15 }
  0xaf   : > { %521 = vmatmul.f32.gmra.mxu1 %v1813_v15 }
  0xb2   : > { %589 = vmatmul.f32.gmra.mxu2 %v1820_v16 }
  0xb3   : > { %654 = vmatmul.f32.gmra.mxu3 %v1820_v16 }
  0xb4   : > { %459 = vmatmul.f32.gmra.mxu0 %v1823_v17 }
  0xb7   : > { %524 = vmatmul.f32.gmra.mxu1 %v1823_v17 }
  0xba   : > { %592 = vmatmul.f32.gmra.mxu2 %v1830_v18 }
  0xbb   : > { %657 = vmatmul.f32.gmra.mxu3 %v1830_v18 }
  0xbc   : > { %462 = vmatmul.f32.gmra.mxu0 %v1833_v19 }
  0xbf   : > { %527 = vmatmul.f32.gmra.mxu1 %v1833_v19 }
  0xc2   : > { %595 = vmatmul.f32.gmra.mxu2 %v1840_v20 }
  0xc3   : > { %660 = vmatmul.f32.gmra.mxu3 %v1840_v20 }
  0xc4   : > { %465 = vmatmul.f32.gmra.mxu0 %v1843_v21 }
  0xc7   : > { %530 = vmatmul.f32.gmra.mxu1 %v1843_v21 }
  0xca   : > { %598 = vmatmul.f32.gmra.mxu2 %v1850_v22 }
  0xcb   : > { %663 = vmatmul.f32.gmra.mxu3 %v1850_v22 }
  0xcc   : > { %468 = vmatmul.f32.gmra.mxu0 %v1853_v23 }
  0xcf   : > { %533 = vmatmul.f32.gmra.mxu1 %v1853_v23 }
  0xd2   : > { %601 = vmatmul.f32.gmra.mxu2 %v1860_v24 }
  0xd3   : > { %666 = vmatmul.f32.gmra.mxu3 %v1860_v24 }
  0xd4   : > { %471 = vmatmul.f32.gmra.mxu0 %v1863_v25 }
  0xd7   : > { %536 = vmatmul.f32.gmra.mxu1 %v1863_v25 }
  0xda   : > { %604 = vmatmul.f32.gmra.mxu2 %v1870_v26 }
  0xdb   : > { %669 = vmatmul.f32.gmra.mxu3 %v1870_v26 }
  0xdc   : > { %474 = vmatmul.f32.gmra.mxu0 %v1873_v27 }
  0xdf   : > { %539 = vmatmul.f32.gmra.mxu1 %v1873_v27 }
  0xe2   : > { %607 = vmatmul.f32.gmra.mxu2 %v1880_v28 }
  0xe3   : > { %672 = vmatmul.f32.gmra.mxu3 %v1880_v28 }
  0xe4   : > { %477 = vmatmul.f32.gmra.mxu0 %v1883_v29 }
  0xe7   : > { %542 = vmatmul.f32.gmra.mxu1 %v1883_v29 }
  0xea   : > { %610 = vmatmul.f32.gmra.mxu2 %v1890_v30 }
  0xeb   : > { %675 = vmatmul.f32.gmra.mxu3 %v1890_v30 }
  0xec   : > { %480 = vmatmul.f32.gmra.mxu0 %v1893_v31 }
  0xef   : > { %545 = vmatmul.f32.gmra.mxu1 %v1893_v31 }
  0xf1   : > { %v436_v32 = vpop.f32.mrf.mxu0 }
  0xf4   : > { %v501_v33 = vpop.f32.mrf.mxu1 }
  0xf5   : > { %v566_v34 = vpop.f32.mrf.mxu2 }
  0xf6   : > { %v631_v35 = vpop.f32.mrf.mxu3  ;;  %v567_v36 = vadd.f32 %v566_v34, %v436_v32 }
  0xf7   : > { %v632_v37 = vadd.f32 %v631_v35, %v501_v33 }
  0xf8   : > { %v679_v38 = vmul.f32 0.2, %v567_v36 }
  0xf9   : > { %v439_v39 = vpop.f32.mrf.mxu0  ;;  %v727_v42 = vmul.f32 0.2, %v632_v37 }
  0xfa   : > { %v695_v40 = vmax.f32 %v567_v36, %v679_v38 }
  0xfb   : > { %v743_v48 = vmax.f32 %v632_v37, %v727_v42 }
  0xfc   : > { %v504_v43 = vpop.f32.mrf.mxu1  ;;  %v711_v44 = vadd.f32 1.0, %v695_v40 }
  0xfd   : > { %v569_v45 = vpop.f32.mrf.mxu2 }
  0xfe   : > { %v634_v46 = vpop.f32.mrf.mxu3  ;;  %v763_v47 = vmul.f32 %v1902_v41, %v711_v44  ;;  %v570_v49 = vadd.f32 %v569_v45, %v439_v39 }
  0xff   : > { %v635_v50 = vadd.f32 %v634_v46, %v504_v43 }
 0x100   : > { %v779_v51 = vadd.f32 %v763_v47, %v743_v48  ;;  %v680_v52 = vmul.f32 0.2, %v570_v49 }
 0x101   : > { %v728_v53 = vmul.f32 0.2, %v635_v50  ;;  %v442_v54 = vpop.f32.mrf.mxu0 }
 0x102   : > { %v696_v55 = vmax.f32 %v570_v49, %v680_v52  ;;  %v795_v56 = vadd.f32 %v779_v51, %v1740_v61 }
 0x103   : > { %v744_v60 = vmax.f32 %v635_v50, %v728_v53 }
 0x104   : > { %v507_v57 = vpop.f32.mrf.mxu1  ;;  %v712_v58 = vadd.f32 1.0, %v696_v55  ;;  %v1907_v59 = vsub.f32 %v795_v56, %v1743_v0 }
 0x105   : > { %v572_v62 = vpop.f32.mrf.mxu2 }
 0x106   : > { %v637_v63 = vpop.f32.mrf.mxu3  ;;  %v764_v1 = vmul.f32 %v1902_v41, %v712_v58  ;;  %v573_v32 = vadd.f32 %v572_v62, %v442_v54  ;;  %v827_v34 = vmul.f32 %v1907_v59, %v1907_v59 }
 0x107   : > { %v638_v33 = vadd.f32 %v637_v63, %v507_v57 }
 0x108   : > { %v780_v35 = vadd.f32 %v764_v1, %v744_v60  ;;  %v681_v36 = vmul.f32 0.2, %v573_v32  ;;  %843 = vadd.xlane.f32.xlu0 %v827_v34 }
 0x109   : > { %v729_v37 = vmul.f32 0.2, %v638_v33  ;;  %v445_v61 = vpop.f32.mrf.mxu0 }
 0x10a   : > { %v697_v38 = vmax.f32 %v573_v32, %v681_v36  ;;  %v796_v39 = vadd.f32 %v780_v35, %v1750_v2 }
 0x10b   : > { %v745_v43 = vmax.f32 %v638_v33, %v729_v37 }
 0x10c   : > { %v510_v0 = vpop.f32.mrf.mxu1  ;;  %v713_v40 = vadd.f32 1.0, %v697_v38  ;;  %v1914_v42 = vsub.f32 %v796_v39, %v1753_v3 }
 0x10d   : > { %v575_v44 = vpop.f32.mrf.mxu2 }
 0x10e   : > { %v640_v45 = vpop.f32.mrf.mxu3  ;;  %v765_v46 = vmul.f32 %v1902_v41, %v713_v40  ;;  %v576_v47 = vadd.f32 %v575_v44, %v445_v61  ;;  %v828_v49 = vmul.f32 %v1914_v42, %v1914_v42 }
 0x10f   : > { %v641_v48 = vadd.f32 %v640_v45, %v510_v0 }
 0x110   : > { %v781_v50 = vadd.f32 %v765_v46, %v745_v43  ;;  %v682_v51 = vmul.f32 0.2, %v576_v47  ;;  %845 = vadd.xlane.f32.xlu0 %v828_v49 }
 0x111   : > { %v730_v52 = vmul.f32 0.2, %v641_v48  ;;  %v448_v2 = vpop.f32.mrf.mxu0 }
 0x112   : > { %v698_v53 = vmax.f32 %v576_v47, %v682_v51  ;;  %v797_v54 = vadd.f32 %v781_v50, %v1760_v4 }
 0x113   : > { %v746_v57 = vmax.f32 %v641_v48, %v730_v52 }
 0x114   : > { %v513_v3 = vpop.f32.mrf.mxu1  ;;  %v714_v55 = vadd.f32 1.0, %v698_v53  ;;  %v1921_v56 = vsub.f32 %v797_v54, %v1763_v5 }
 0x115   : > { %v578_v58 = vpop.f32.mrf.mxu2 }
 0x116   : > { %v643_v60 = vpop.f32.mrf.mxu3  ;;  %v766_v62 = vmul.f32 %v1902_v41, %v714_v55  ;;  %v579_v63 = vadd.f32 %v578_v58, %v448_v2  ;;  %v829_v32 = vmul.f32 %v1921_v56, %v1921_v56 }
 0x117   : > { %v644_v1 = vadd.f32 %v643_v60, %v513_v3 }
 0x118   : > { %v782_v33 = vadd.f32 %v766_v62, %v746_v57  ;;  %v683_v34 = vmul.f32 0.2, %v579_v63  ;;  %847 = vadd.xlane.f32.xlu1 %v829_v32 }
 0x119   : > { %v731_v35 = vmul.f32 0.2, %v644_v1  ;;  %v451_v4 = vpop.f32.mrf.mxu0 }
 0x11a   : > { %v699_v36 = vmax.f32 %v579_v63, %v683_v34  ;;  %v798_v37 = vadd.f32 %v782_v33, %v1770_v6 }
 0x11b   : > { %v747_v39 = vmax.f32 %v644_v1, %v731_v35 }
 0x11c   : > { %v516_v5 = vpop.f32.mrf.mxu1  ;;  %v715_v61 = vadd.f32 1.0, %v699_v36  ;;  %v1928_v38 = vsub.f32 %v798_v37, %v1773_v7 }
 0x11d   : > { %v581_v0 = vpop.f32.mrf.mxu2 }
 0x11e   : > { %v646_v40 = vpop.f32.mrf.mxu3  ;;  %v767_v43 = vmul.f32 %v1902_v41, %v715_v61  ;;  %v582_v44 = vadd.f32 %v581_v0, %v451_v4  ;;  %v830_v46 = vmul.f32 %v1928_v38, %v1928_v38 }
 0x11f   : > { %v647_v45 = vadd.f32 %v646_v40, %v516_v5 }
 0x120   : > { %v783_v47 = vadd.f32 %v767_v43, %v747_v39  ;;  %v684_v48 = vmul.f32 0.2, %v582_v44  ;;  %849 = vadd.xlane.f32.xlu1 %v830_v46 }
 0x121   : > { %v732_v49 = vmul.f32 0.2, %v647_v45  ;;  %v454_v6 = vpop.f32.mrf.mxu0 }
 0x122   : > { %v700_v50 = vmax.f32 %v582_v44, %v684_v48  ;;  %v799_v51 = vadd.f32 %v783_v47, %v1780_v8 }
 0x123   : > { %v748_v53 = vmax.f32 %v647_v45, %v732_v49 }
 0x124   : > { %v519_v7 = vpop.f32.mrf.mxu1  ;;  %v716_v52 = vadd.f32 1.0, %v700_v50  ;;  %v1935_v2 = vsub.f32 %v799_v51, %v1783_v9 }
 0x125   : > { %v584_v54 = vpop.f32.mrf.mxu2 }
 0x126   : > { %v649_v3 = vpop.f32.mrf.mxu3  ;;  %v768_v55 = vmul.f32 %v1902_v41, %v716_v52  ;;  %v585_v57 = vadd.f32 %v584_v54, %v454_v6  ;;  %v831_v60 = vmul.f32 %v1935_v2, %v1935_v2 }
 0x127   : > { %v650_v58 = vadd.f32 %v649_v3, %v519_v7 }
 0x128   : > { %v784_v62 = vadd.f32 %v768_v55, %v748_v53  ;;  %v685_v63 = vmul.f32 0.2, %v585_v57  ;;  %851 = vadd.xlane.f32.xlu2 %v831_v60 }
 0x129   : > { %v733_v1 = vmul.f32 0.2, %v650_v58  ;;  %v457_v8 = vpop.f32.mrf.mxu0 }
 0x12a   : > { %v701_v32 = vmax.f32 %v585_v57, %v685_v63  ;;  %v800_v33 = vadd.f32 %v784_v62, %v1790_v10 }
 0x12b   : > { %v749_v4 = vmax.f32 %v650_v58, %v733_v1 }
 0x12c   : > { %v522_v9 = vpop.f32.mrf.mxu1  ;;  %v717_v34 = vadd.f32 1.0, %v701_v32  ;;  %v1942_v35 = vsub.f32 %v800_v33, %v1793_v11 }
 0x12d   : > { %v587_v36 = vpop.f32.mrf.mxu2 }
 0x12e   : > { %v652_v37 = vpop.f32.mrf.mxu3  ;;  %v769_v5 = vmul.f32 %v1902_v41, %v717_v34  ;;  %v588_v61 = vadd.f32 %v587_v36, %v457_v8  ;;  %v832_v0 = vmul.f32 %v1942_v35, %v1942_v35 }
 0x12f   : > { %v653_v39 = vadd.f32 %v652_v37, %v522_v9 }
 0x130   : > { %v785_v40 = vadd.f32 %v769_v5, %v749_v4  ;;  %v686_v43 = vmul.f32 0.2, %v588_v61  ;;  %853 = vadd.xlane.f32.xlu2 %v832_v0 }
 0x131   : > { %v734_v44 = vmul.f32 0.2, %v653_v39  ;;  %v460_v10 = vpop.f32.mrf.mxu0 }
 0x132   : > { %v702_v45 = vmax.f32 %v588_v61, %v686_v43  ;;  %v801_v46 = vadd.f32 %v785_v40, %v1800_v12 }
 0x133   : > { %v750_v49 = vmax.f32 %v653_v39, %v734_v44 }
 0x134   : > { %v525_v11 = vpop.f32.mrf.mxu1  ;;  %v718_v47 = vadd.f32 1.0, %v702_v45  ;;  %v1949_v48 = vsub.f32 %v801_v46, %v1803_v13 }
 0x135   : > { %v590_v6 = vpop.f32.mrf.mxu2 }
 0x136   : > { %v655_v50 = vpop.f32.mrf.mxu3  ;;  %v770_v51 = vmul.f32 %v1902_v41, %v718_v47  ;;  %v591_v7 = vadd.f32 %v590_v6, %v460_v10  ;;  %v833_v53 = vmul.f32 %v1949_v48, %v1949_v48 }
 0x137   : > { %v656_v52 = vadd.f32 %v655_v50, %v525_v11 }
 0x138   : > { %v786_v54 = vadd.f32 %v770_v51, %v750_v49  ;;  %v687_v3 = vmul.f32 0.2, %v591_v7  ;;  %855 = vadd.xlane.f32.xlu0 %v833_v53 }
 0x139   : > { %v735_v55 = vmul.f32 0.2, %v656_v52  ;;  %v463_v12 = vpop.f32.mrf.mxu0 }
 0x13a   : > { %v703_v57 = vmax.f32 %v591_v7, %v687_v3  ;;  %v802_v58 = vadd.f32 %v786_v54, %v1810_v14 }
 0x13b   : > { %v751_v63 = vmax.f32 %v656_v52, %v735_v55 }
 0x13c   : > { %v528_v13 = vpop.f32.mrf.mxu1  ;;  %v719_v60 = vadd.f32 1.0, %v703_v57  ;;  %v1956_v62 = vsub.f32 %v802_v58, %v1813_v15 }
 0x13d   : > { %v593_v1 = vpop.f32.mrf.mxu2 }
 0x13e   : > { %v658_v8 = vpop.f32.mrf.mxu3  ;;  %v771_v32 = vmul.f32 %v1902_v41, %v719_v60  ;;  %v594_v33 = vadd.f32 %v593_v1, %v463_v12  ;;  %v834_v34 = vmul.f32 %v1956_v62, %v1956_v62 }
 0x13f   : > { %v659_v9 = vadd.f32 %v658_v8, %v528_v13 }
 0x140   : > { %v787_v4 = vadd.f32 %v771_v32, %v751_v63  ;;  %v688_v36 = vmul.f32 0.2, %v594_v33  ;;  %857 = vadd.xlane.f32.xlu1 %v834_v34 }
 0x141   : > { %v736_v37 = vmul.f32 0.2, %v659_v9  ;;  %v466_v14 = vpop.f32.mrf.mxu0 }
 0x142   : > { %v704_v5 = vmax.f32 %v594_v33, %v688_v36  ;;  %v803_v61 = vadd.f32 %v787_v4, %v1820_v16 }
 0x143   : > { %v752_v40 = vmax.f32 %v659_v9, %v736_v37 }
 0x144   : > { %v531_v15 = vpop.f32.mrf.mxu1  ;;  %v720_v39 = vadd.f32 1.0, %v704_v5  ;;  %v1963_v0 = vsub.f32 %v803_v61, %v1823_v17 }
 0x145   : > { %v596_v43 = vpop.f32.mrf.mxu2 }
 0x146   : > { %v661_v44 = vpop.f32.mrf.mxu3  ;;  %v772_v10 = vmul.f32 %v1902_v41, %v720_v39  ;;  %v597_v45 = vadd.f32 %v596_v43, %v466_v14  ;;  %v835_v11 = vmul.f32 %v1963_v0, %v1963_v0 }
 0x147   : > { %v662_v46 = vadd.f32 %v661_v44, %v531_v15 }
 0x148   : > { %v788_v47 = vadd.f32 %v772_v10, %v752_v40  ;;  %v689_v49 = vmul.f32 0.2, %v597_v45  ;;  %859 = vadd.xlane.f32.xlu2 %v835_v11 }
 0x149   : > { %v737_v6 = vmul.f32 0.2, %v662_v46  ;;  %v469_v16 = vpop.f32.mrf.mxu0 }
 0x14a   : > { %v705_v50 = vmax.f32 %v597_v45, %v689_v49  ;;  %v804_v51 = vadd.f32 %v788_v47, %v1830_v18 }
 0x14b   : > { %v753_v53 = vmax.f32 %v662_v46, %v737_v6 }
 0x14c   : > { %v534_v17 = vpop.f32.mrf.mxu1  ;;  %v721_v7 = vadd.f32 1.0, %v705_v50  ;;  %v1970_v52 = vsub.f32 %v804_v51, %v1833_v19 }
 0x14d   : > { %v599_v54 = vpop.f32.mrf.mxu2 }
 0x14e   : > { %v664_v3 = vpop.f32.mrf.mxu3  ;;  %v773_v55 = vmul.f32 %v1902_v41, %v721_v7  ;;  %v600_v12 = vadd.f32 %v599_v54, %v469_v16  ;;  %v836_v58 = vmul.f32 %v1970_v52, %v1970_v52 }
 0x14f   : > { %v665_v57 = vadd.f32 %v664_v3, %v534_v17 }
 0x150   : > { %v789_v13 = vadd.f32 %v773_v55, %v753_v53  ;;  %v690_v60 = vmul.f32 0.2, %v600_v12  ;;  %861 = vadd.xlane.f32.xlu0 %v836_v58 }
 0x151   : > { %v738_v63 = vmul.f32 0.2, %v665_v57  ;;  %v472_v18 = vpop.f32.mrf.mxu0 }
 0x152   : > { %v706_v1 = vmax.f32 %v600_v12, %v690_v60  ;;  %v805_v8 = vadd.f32 %v789_v13, %v1840_v20 }
 0x153   : > { %v754_v9 = vmax.f32 %v665_v57, %v738_v63 }
 0x154   : > { %v537_v19 = vpop.f32.mrf.mxu1  ;;  %v722_v32 = vadd.f32 1.0, %v706_v1  ;;  %v1977_v33 = vsub.f32 %v805_v8, %v1843_v21 }
 0x155   : > { %v602_v34 = vpop.f32.mrf.mxu2 }
 0x156   : > { %v667_v4 = vpop.f32.mrf.mxu3  ;;  %v774_v36 = vmul.f32 %v1902_v41, %v722_v32  ;;  %v603_v37 = vadd.f32 %v602_v34, %v472_v18  ;;  %v837_v5 = vmul.f32 %v1977_v33, %v1977_v33 }
 0x157   : > { %v668_v14 = vadd.f32 %v667_v4, %v537_v19 }
 0x158   : > { %v790_v61 = vadd.f32 %v774_v36, %v754_v9  ;;  %v691_v15 = vmul.f32 0.2, %v603_v37  ;;  %863 = vadd.xlane.f32.xlu1 %v837_v5 }
 0x159   : > { %v739_v39 = vmul.f32 0.2, %v668_v14  ;;  %v475_v20 = vpop.f32.mrf.mxu0 }
 0x15a   : > { %v707_v40 = vmax.f32 %v603_v37, %v691_v15  ;;  %v806_v43 = vadd.f32 %v790_v61, %v1850_v22 }
 0x15b   : > { %v755_v45 = vmax.f32 %v668_v14, %v739_v39 }
 0x15c   : > { %v540_v21 = vpop.f32.mrf.mxu1  ;;  %v723_v44 = vadd.f32 1.0, %v707_v40  ;;  %v1984_v10 = vsub.f32 %v806_v43, %v1853_v23 }
 0x15d   : > { %v605_v46 = vpop.f32.mrf.mxu2 }
 0x15e   : > { %v670_v11 = vpop.f32.mrf.mxu3  ;;  %v775_v47 = vmul.f32 %v1902_v41, %v723_v44  ;;  %v606_v49 = vadd.f32 %v605_v46, %v475_v20  ;;  %v838_v16 = vmul.f32 %v1984_v10, %v1984_v10 }
 0x15f   : > { %v671_v6 = vadd.f32 %v670_v11, %v540_v21 }
 0x160   : > { %v791_v50 = vadd.f32 %v775_v47, %v755_v45  ;;  %v692_v51 = vmul.f32 0.2, %v606_v49  ;;  %865 = vadd.xlane.f32.xlu2 %v838_v16 }
 0x161   : > { %v740_v17 = vmul.f32 0.2, %v671_v6  ;;  %v478_v22 = vpop.f32.mrf.mxu0 }
 0x162   : > { %v708_v7 = vmax.f32 %v606_v49, %v692_v51  ;;  %v807_v53 = vadd.f32 %v791_v50, %v1860_v24 }
 0x163   : > { %v756_v55 = vmax.f32 %v671_v6, %v740_v17 }
 0x164   : > { %v543_v23 = vpop.f32.mrf.mxu1  ;;  %v724_v54 = vadd.f32 1.0, %v708_v7  ;;  %v1991_v3 = vsub.f32 %v807_v53, %v1863_v25 }
 0x165   : > { %v608_v12 = vpop.f32.mrf.mxu2 }
 0x166   : > { %v673_v57 = vpop.f32.mrf.mxu3  ;;  %v776_v58 = vmul.f32 %v1902_v41, %v724_v54  ;;  %v609_v13 = vadd.f32 %v608_v12, %v478_v22  ;;  %v839_v63 = vmul.f32 %v1991_v3, %v1991_v3 }
 0x167   : > { %v674_v60 = vadd.f32 %v673_v57, %v543_v23 }
 0x168   : > { %v792_v18 = vadd.f32 %v776_v58, %v756_v55  ;;  %v693_v1 = vmul.f32 0.2, %v609_v13  ;;  %867 = vadd.xlane.f32.xlu0 %v839_v63 }
 0x169   : > { %v741_v8 = vmul.f32 0.2, %v674_v60  ;;  %v481_v32 = vpop.f32.mrf.mxu0 }
 0x16a   : > { %v709_v24 = vmax.f32 %v609_v13, %v693_v1  ;;  %v808_v19 = vadd.f32 %v792_v18, %v1870_v26 }
 0x16b   : > { %v757_v4 = vmax.f32 %v674_v60, %v741_v8 }
 0x16c   : > { %v546_v25 = vpop.f32.mrf.mxu1  ;;  %v725_v9 = vadd.f32 1.0, %v709_v24  ;;  %v1998_v34 = vsub.f32 %v808_v19, %v1873_v27 }
 0x16d   : > { %v611_v36 = vpop.f32.mrf.mxu2 }
 0x16e   : > { %v676_v37 = vpop.f32.mrf.mxu3  ;;  %v777_v14 = vmul.f32 %v1902_v41, %v725_v9  ;;  %v612_v5 = vadd.f32 %v611_v36, %v481_v32  ;;  %v840_v15 = vmul.f32 %v1998_v34, %v1998_v34 }
 0x16f   : > { %v677_v61 = vadd.f32 %v676_v37, %v546_v25 }
 0x170   : > { %v793_v39 = vadd.f32 %v777_v14, %v757_v4  ;;  %v694_v20 = vmul.f32 0.2, %v612_v5  ;;  %869 = vadd.xlane.f32.xlu1 %v840_v15 }
 0x171   : > { %v742_v40 = vmul.f32 0.2, %v677_v61 }
 0x172   : > { %v710_v26 = vmax.f32 %v612_v5, %v694_v20  ;;  %v809_v43 = vadd.f32 %v793_v39, %v1880_v28 }
 0x173   : > { %v758_v45 = vmax.f32 %v677_v61, %v742_v40 }
 0x174   : > { %v726_v21 = vadd.f32 1.0, %v710_v26  ;;  %v2005_v27 = vsub.f32 %v809_v43, %v1883_v29 }
 0x176   : > { %v778_v44 = vmul.f32 %v1902_v41, %v726_v21  ;;  %v841_v46 = vmul.f32 %v2005_v27, %v2005_v27 }
 0x178   : > { %v794_v11 = vadd.f32 %v778_v44, %v758_v45  ;;  %871 = vadd.xlane.f32.xlu2 %v841_v46 }
 0x17a   : > { %v810_v47 = vadd.f32 %v794_v11, %v1890_v30 }
 0x17b   : > { %v844_v49 = vpop.xlane.xlu0 %843 }
 0x17c   : > { %v875_v6 = vmax.f32 %v844_v49, 1e-24  ;;  %v2012_v16 = vsub.f32 %v810_v47, %v1893_v31 }
 0x17e   : > { %1318 = vrsqrt.f32 %v875_v6  ;;  %v842_v28 = vmul.f32 %v2012_v16, %v2012_v16  ;;  %vm897_vm1 = vweird.f32 %v875_v6 }
 0x180   : > { %873 = vadd.xlane.f32.xlu0 %v842_v28 }
 0x183   : > { %v846_v29 = vpop.xlane.xlu0 %845 }
 0x184   : > { %v1319_v41 = vpop.eup %1318  ;;  %v876_v50 = vmax.f32 %v846_v29, 1e-24 }
 0x185   : > { %v892_v51 = vmul.f32 %v1319_v41, %v875_v6  ;;  %vm898_vm0 = vweird.f32 %v1319_v41 }
 0x186   : > { %1320 = vrsqrt.f32 %v876_v50  ;;  %vm899_vm2 = vmor %vm897_vm1, %vm898_vm0  ;;  %vm907_vm4 = vweird.f32 %v876_v50 }
 0x187   : > { %v893_v17 = vmul.f32 %v1319_v41, %v892_v51 }
 0x189   : > { %v894_v22 = vmul.f32 0.5, %v893_v17 }
 0x18b   : > { %v895_v7 = vsub.f32 1.5, %v894_v22  ;;  %v848_v30 = vpop.xlane.xlu1 %847 }
 0x18c   : > { %v1321_v53 = vpop.eup %1320  ;;  %v877_v23 = vmax.f32 %v848_v30, 1e-24 }
 0x18d   : > { %v896_v31 = vmul.f32 %v1319_v41, %v895_v7  ;;  %v902_v54 = vmul.f32 %v1321_v53, %v876_v50  ;;  %vm908_vm3 = vweird.f32 %v1321_v53 }
 0x18e   : > { %1322 = vrsqrt.f32 %v877_v23  ;;  %vm909_vm5 = vmor %vm907_vm4, %vm908_vm3  ;;  %vm917_vm7 = vweird.f32 %v877_v23 }
 0x18f   : > { %v900_v55 = vsel %vm899_vm2, %v1319_v41, %v896_v31  ;;  %v903_v12 = vmul.f32 %v1321_v53, %v902_v54 }
 0x190   : > { %v1051_v57 = vmul.f32 %v900_v55, %v1907_v59 }
 0x191   : > { %v904_v58 = vmul.f32 0.5, %v903_v12 }
 0x192   : > { %1067 = vst [vmem:[%s2018_s30] sm:$0xff] %v1051_v57 }
 0x193   : > { %v905_v13 = vsub.f32 1.5, %v904_v58  ;;  %v850_v60 = vpop.xlane.xlu1 %849 }
 0x194   : > { %v1323_v63 = vpop.eup %1322  ;;  %v878_v18 = vmax.f32 %v850_v60, 1e-24 }
 0x195   : > { %v906_v1 = vmul.f32 %v1321_v53, %v905_v13  ;;  %v912_v8 = vmul.f32 %v1323_v63, %v877_v23  ;;  %vm918_vm6 = vweird.f32 %v1323_v63 }
 0x196   : > { %1324 = vrsqrt.f32 %v878_v18  ;;  %vm919_vm8 = vmor %vm917_vm7, %vm918_vm6  ;;  %vm927_vm10 = vweird.f32 %v878_v18 }
 0x197   : > { %v910_v24 = vsel %vm909_vm5, %v1321_v53, %v906_v1  ;;  %v913_v19 = vmul.f32 %v1323_v63, %v912_v8 }
 0x198   : > { %v1052_v59 = vmul.f32 %v910_v24, %v1914_v42 }
 0x199   : > { %v914_v32 = vmul.f32 0.5, %v913_v19 }
 0x19a   : > { %1068 = vst [vmem:[%s2018_s30 + $0x8] sm:$0xff] %v1052_v59 }
 0x19b   : > { %v915_v25 = vsub.f32 1.5, %v914_v32  ;;  %v852_v9 = vpop.xlane.xlu2 %851 }
 0x19c   : > { %v1325_v4 = vpop.eup %1324  ;;  %v879_v36 = vmax.f32 %v852_v9, 1e-24 }
 0x19d   : > { %v916_v37 = vmul.f32 %v1323_v63, %v915_v25  ;;  %v922_v14 = vmul.f32 %v1325_v4, %v878_v18  ;;  %vm928_vm9 = vweird.f32 %v1325_v4 }
 0x19e   : > { %1326 = vrsqrt.f32 %v879_v36  ;;  %vm929_vm11 = vmor %vm927_vm10, %vm928_vm9  ;;  %vm937_vm13 = vweird.f32 %v879_v36 }
 0x19f   : > { %v920_v5 = vsel %vm919_vm8, %v1323_v63, %v916_v37  ;;  %v923_v61 = vmul.f32 %v1325_v4, %v922_v14 }
 0x1a0   : > { %v1053_v15 = vmul.f32 %v920_v5, %v1921_v56 }
 0x1a1   : > { %v924_v39 = vmul.f32 0.5, %v923_v61 }
 0x1a2   : > { %1069 = vst [vmem:[%s2018_s30 + $0x10] sm:$0xff] %v1053_v15 }
 0x1a3   : > { %v925_v42 = vsub.f32 1.5, %v924_v39  ;;  %v854_v20 = vpop.xlane.xlu2 %853 }
 0x1a4   : > { %v1327_v26 = vpop.eup %1326  ;;  %v880_v40 = vmax.f32 %v854_v20, 1e-24 }
 0x1a5   : > { %v926_v43 = vmul.f32 %v1325_v4, %v925_v42  ;;  %v932_v21 = vmul.f32 %v1327_v26, %v879_v36  ;;  %vm938_vm12 = vweird.f32 %v1327_v26 }
 0x1a6   : > { %1328 = vrsqrt.f32 %v880_v40  ;;  %vm939_vm14 = vmor %vm937_vm13, %vm938_vm12  ;;  %vm947_vm0 = vweird.f32 %v880_v40 }
 0x1a7   : > { %v930_v44 = vsel %vm929_vm11, %v1325_v4, %v926_v43  ;;  %v933_v45 = vmul.f32 %v1327_v26, %v932_v21 }
 0x1a8   : > { %v1054_v46 = vmul.f32 %v930_v44, %v1928_v38 }
 0x1a9   : > { %v934_v11 = vmul.f32 0.5, %v933_v45 }
 0x1aa   : > { %1070 = vst [vmem:[%s2018_s30 + $0x18] sm:$0xff] %v1054_v46 }
 0x1ab   : > { %v935_v56 = vsub.f32 1.5, %v934_v11  ;;  %v856_v47 = vpop.xlane.xlu0 %855 }
 0x1ac   : > { %v1329_v49 = vpop.eup %1328  ;;  %v881_v6 = vmax.f32 %v856_v47, 1e-24 }
 0x1ad   : > { %v936_v28 = vmul.f32 %v1327_v26, %v935_v56  ;;  %v942_v29 = vmul.f32 %v1329_v49, %v880_v40  ;;  %vm948_vm15 = vweird.f32 %v1329_v49 }
 0x1ae   : > { %1330 = vrsqrt.f32 %v881_v6  ;;  %vm949_vm1 = vmor %vm947_vm0, %vm948_vm15  ;;  %vm957_vm3 = vweird.f32 %v881_v6 }
 0x1af   : > { %v940_v41 = vsel %vm939_vm14, %v1327_v26, %v936_v28  ;;  %v943_v50 = vmul.f32 %v1329_v49, %v942_v29 }
 0x1b0   : > { %v1055_v51 = vmul.f32 %v940_v41, %v1935_v2 }
 0x1b1   : > { %v944_v17 = vmul.f32 0.5, %v943_v50 }
 0x1b2   : > { %1071 = vst [vmem:[%s2018_s30 + $0x20] sm:$0xff] %v1055_v51 }
 0x1b3   : > { %v945_v38 = vsub.f32 1.5, %v944_v17  ;;  %v858_v22 = vpop.xlane.xlu1 %857 }
 0x1b4   : > { %v1331_v7 = vpop.eup %1330  ;;  %v882_v30 = vmax.f32 %v858_v22, 1e-24 }
 0x1b5   : > { %v946_v53 = vmul.f32 %v1329_v49, %v945_v38  ;;  %v952_v23 = vmul.f32 %v1331_v7, %v881_v6  ;;  %vm958_vm2 = vweird.f32 %v1331_v7 }
 0x1b6   : > { %1332 = vrsqrt.f32 %v882_v30  ;;  %vm959_vm4 = vmor %vm957_vm3, %vm958_vm2  ;;  %vm967_vm6 = vweird.f32 %v882_v30 }
 0x1b7   : > { %v950_v31 = vsel %vm949_vm1, %v1329_v49, %v946_v53  ;;  %v953_v54 = vmul.f32 %v1331_v7, %v952_v23 }
 0x1b8   : > { %v1056_v55 = vmul.f32 %v950_v31, %v1942_v35 }
 0x1b9   : > { %v954_v12 = vmul.f32 0.5, %v953_v54 }
 0x1ba   : > { %1072 = vst [vmem:[%s2018_s30 + $0x28] sm:$0xff] %v1056_v55 }
 0x1bb   : > { %v955_v2 = vsub.f32 1.5, %v954_v12  ;;  %v860_v57 = vpop.xlane.xlu2 %859 }
 0x1bc   : > { %v1333_v58 = vpop.eup %1332  ;;  %v883_v13 = vmax.f32 %v860_v57, 1e-24 }
 0x1bd   : > { %v956_v60 = vmul.f32 %v1331_v7, %v955_v2  ;;  %v962_v63 = vmul.f32 %v1333_v58, %v882_v30  ;;  %vm968_vm5 = vweird.f32 %v1333_v58 }
 0x1be   : > { %1334 = vrsqrt.f32 %v883_v13  ;;  %vm969_vm7 = vmor %vm967_vm6, %vm968_vm5  ;;  %vm977_vm9 = vweird.f32 %v883_v13 }
 0x1bf   : > { %v960_v18 = vsel %vm959_vm4, %v1331_v7, %v956_v60  ;;  %v963_v1 = vmul.f32 %v1333_v58, %v962_v63 }
 0x1c0   : > { %v1057_v8 = vmul.f32 %v960_v18, %v1949_v48 }
 0x1c1   : > { %v964_v24 = vmul.f32 0.5, %v963_v1 }
 0x1c2   : > { %1073 = vst [vmem:[%s2018_s30 + $0x30] sm:$0xff] %v1057_v8 }
 0x1c3   : > { %v965_v35 = vsub.f32 1.5, %v964_v24  ;;  %v862_v19 = vpop.xlane.xlu0 %861 }
 0x1c4   : > { %v1335_v59 = vpop.eup %1334  ;;  %v884_v32 = vmax.f32 %v862_v19, 1e-24 }
 0x1c5   : > { %v966_v25 = vmul.f32 %v1333_v58, %v965_v35  ;;  %v972_v9 = vmul.f32 %v1335_v59, %v883_v13  ;;  %vm978_vm8 = vweird.f32 %v1335_v59 }
 0x1c6   : > { %1336 = vrsqrt.f32 %v884_v32  ;;  %vm979_vm10 = vmor %vm977_vm9, %vm978_vm8  ;;  %vm987_vm12 = vweird.f32 %v884_v32 }
 0x1c7   : > { %v970_v4 = vsel %vm969_vm7, %v1333_v58, %v966_v25  ;;  %v973_v36 = vmul.f32 %v1335_v59, %v972_v9 }
 0x1c8   : > { %v1058_v37 = vmul.f32 %v970_v4, %v1956_v62 }
 0x1c9   : > { %v974_v14 = vmul.f32 0.5, %v973_v36 }
 0x1ca   : > { %1074 = vst [vmem:[%s2018_s30 + $0x38] sm:$0xff] %v1058_v37 }
 0x1cb   : > { %v975_v48 = vsub.f32 1.5, %v974_v14  ;;  %v864_v5 = vpop.xlane.xlu1 %863 }
 0x1cc   : > { %v1337_v61 = vpop.eup %1336  ;;  %v885_v15 = vmax.f32 %v864_v5, 1e-24 }
 0x1cd   : > { %v976_v39 = vmul.f32 %v1335_v59, %v975_v48  ;;  %v982_v42 = vmul.f32 %v1337_v61, %v884_v32  ;;  %vm988_vm11 = vweird.f32 %v1337_v61 }
 0x1ce   : > { %1338 = vrsqrt.f32 %v885_v15  ;;  %vm989_vm13 = vmor %vm987_vm12, %vm988_vm11  ;;  %vm997_vm15 = vweird.f32 %v885_v15 }
 0x1cf   : > { %v980_v20 = vsel %vm979_vm10, %v1335_v59, %v976_v39  ;;  %v983_v26 = vmul.f32 %v1337_v61, %v982_v42 }
 0x1d0   : > { %v1059_v40 = vmul.f32 %v980_v20, %v1963_v0 }
 0x1d1   : > { %v984_v43 = vmul.f32 0.5, %v983_v26 }
 0x1d2   : > { %1075 = vst [vmem:[%s2018_s30 + $0x40] sm:$0xff] %v1059_v40 }
 0x1d3   : > { %v985_v62 = vsub.f32 1.5, %v984_v43  ;;  %v866_v21 = vpop.xlane.xlu2 %865 }
 0x1d4   : > { %v1339_v44 = vpop.eup %1338  ;;  %v886_v45 = vmax.f32 %v866_v21, 1e-24 }
 0x1d5   : > { %v986_v46 = vmul.f32 %v1337_v61, %v985_v62  ;;  %v992_v11 = vmul.f32 %v1339_v44, %v885_v15  ;;  %vm998_vm14 = vweird.f32 %v1339_v44 }
 0x1d6   : > { %1340 = vrsqrt.f32 %v886_v45  ;;  %vm999_vm0 = vmor %vm997_vm15, %vm998_vm14  ;;  %vm1007_vm2 = vweird.f32 %v886_v45 }
 0x1d7   : > { %v990_v56 = vsel %vm989_vm13, %v1337_v61, %v986_v46  ;;  %v993_v47 = vmul.f32 %v1339_v44, %v992_v11 }
 0x1d8   : > { %v1060_v49 = vmul.f32 %v990_v56, %v1970_v52 }
 0x1d9   : > { %v994_v6 = vmul.f32 0.5, %v993_v47 }
 0x1da   : > { %1076 = vst [vmem:[%s2018_s30 + $0x48] sm:$0xff] %v1060_v49 }
 0x1db   : > { %v995_v0 = vsub.f32 1.5, %v994_v6  ;;  %v868_v28 = vpop.xlane.xlu0 %867 }
 0x1dc   : > { %v1341_v29 = vpop.eup %1340  ;;  %v887_v41 = vmax.f32 %v868_v28, 1e-24 }
 0x1dd   : > { %v996_v50 = vmul.f32 %v1339_v44, %v995_v0  ;;  %v1002_v51 = vmul.f32 %v1341_v29, %v886_v45  ;;  %vm1008_vm1 = vweird.f32 %v1341_v29 }
 0x1de   : > { %1342 = vrsqrt.f32 %v887_v41  ;;  %vm1009_vm3 = vmor %vm1007_vm2, %vm1008_vm1  ;;  %vm1017_vm5 = vweird.f32 %v887_v41 }
 0x1df   : > { %v1000_v17 = vsel %vm999_vm0, %v1339_v44, %v996_v50  ;;  %v1003_v38 = vmul.f32 %v1341_v29, %v1002_v51 }
 0x1e0   : > { %v1061_v22 = vmul.f32 %v1000_v17, %v1977_v33 }
 0x1e1   : > { %v1004_v7 = vmul.f32 0.5, %v1003_v38 }
 0x1e2   : > { %1077 = vst [vmem:[%s2018_s30 + $0x50] sm:$0xff] %v1061_v22 }
 0x1e3   : > { %v1005_v52 = vsub.f32 1.5, %v1004_v7  ;;  %v870_v30 = vpop.xlane.xlu1 %869 }
 0x1e4   : > { %v1343_v53 = vpop.eup %1342  ;;  %v888_v23 = vmax.f32 %v870_v30, 1e-24 }
 0x1e5   : > { %v1006_v31 = vmul.f32 %v1341_v29, %v1005_v52  ;;  %v1012_v54 = vmul.f32 %v1343_v53, %v887_v41  ;;  %vm1018_vm4 = vweird.f32 %v1343_v53 }
 0x1e6   : > { %1344 = vrsqrt.f32 %v888_v23  ;;  %vm1019_vm6 = vmor %vm1017_vm5, %vm1018_vm4  ;;  %vm1027_vm8 = vweird.f32 %v888_v23 }
 0x1e7   : > { %v1010_v55 = vsel %vm1009_vm3, %v1341_v29, %v1006_v31  ;;  %v1013_v12 = vmul.f32 %v1343_v53, %v1012_v54 }
 0x1e8   : > { %v1062_v2 = vmul.f32 %v1010_v55, %v1984_v10 }
 0x1e9   : > { %v1014_v57 = vmul.f32 0.5, %v1013_v12 }
 0x1ea   : > { %1078 = vst [vmem:[%s2018_s30 + $0x58] sm:$0xff] %v1062_v2 }
 0x1eb   : > { %v1015_v33 = vsub.f32 1.5, %v1014_v57  ;;  %v872_v58 = vpop.xlane.xlu2 %871 }
 0x1ec   : > { %v1345_v13 = vpop.eup %1344  ;;  %v889_v60 = vmax.f32 %v872_v58, 1e-24 }
 0x1ed   : > { %v1016_v63 = vmul.f32 %v1343_v53, %v1015_v33  ;;  %v1022_v18 = vmul.f32 %v1345_v13, %v888_v23  ;;  %vm1028_vm7 = vweird.f32 %v1345_v13 }
 0x1ee   : > { %1346 = vrsqrt.f32 %v889_v60  ;;  %vm1029_vm9 = vmor %vm1027_vm8, %vm1028_vm7  ;;  %vm1037_vm11 = vweird.f32 %v889_v60 }
 0x1ef   : > { %v1020_v1 = vsel %vm1019_vm6, %v1343_v53, %v1016_v63  ;;  %v1023_v8 = vmul.f32 %v1345_v13, %v1022_v18 }
 0x1f0   : > { %v1063_v24 = vmul.f32 %v1020_v1, %v1991_v3 }
 0x1f1   : > { %v1024_v35 = vmul.f32 0.5, %v1023_v8 }
 0x1f2   : > { %1079 = vst [vmem:[%s2018_s30 + $0x60] sm:$0xff] %v1063_v24 }
 0x1f3   : > { %v1025_v10 = vsub.f32 1.5, %v1024_v35  ;;  %v874_v19 = vpop.xlane.xlu0 %873 }
 0x1f4   : > { %v1347_v59 = vpop.eup %1346  ;;  %v890_v32 = vmax.f32 %v874_v19, 1e-24 }
 0x1f5   : > { %v1026_v25 = vmul.f32 %v1345_v13, %v1025_v10  ;;  %v1032_v9 = vmul.f32 %v1347_v59, %v889_v60  ;;  %vm1038_vm10 = vweird.f32 %v1347_v59 }
 0x1f6   : > { %1348 = vrsqrt.f32 %v890_v32  ;;  %vm1039_vm12 = vmor %vm1037_vm11, %vm1038_vm10  ;;  %vm1047_vm14 = vweird.f32 %v890_v32 }
 0x1f7   : > { %v1030_v4 = vsel %vm1029_vm9, %v1345_v13, %v1026_v25  ;;  %v1033_v36 = vmul.f32 %v1347_v59, %v1032_v9 }
 0x1f8   : > { %v1064_v37 = vmul.f32 %v1030_v4, %v1998_v34 }
 0x1f9   : > { %v1034_v3 = vmul.f32 0.5, %v1033_v36 }
 0x1fa   : > { %1080 = vst [vmem:[%s2018_s30 + $0x68] sm:$0xff] %v1064_v37 }
 0x1fb   : > { %v1035_v14 = vsub.f32 1.5, %v1034_v3 }
 0x1fc   : > { %v1349_v48 = vpop.eup %1348 }
 0x1fd   : > { %v1036_v5 = vmul.f32 %v1347_v59, %v1035_v14  ;;  %v1042_v61 = vmul.f32 %v1349_v48, %v890_v32  ;;  %vm1048_vm13 = vweird.f32 %v1349_v48 }
 0x1fe   : > { %vm1049_vm15 = vmor %vm1047_vm14, %vm1048_vm13 }
 0x1ff   : > { %v1040_v15 = vsel %vm1039_vm12, %v1347_v59, %v1036_v5  ;;  %v1043_v39 = vmul.f32 %v1349_v48, %v1042_v61 }
 0x200   : > { %v1065_v42 = vmul.f32 %v1040_v15, %v2005_v27 }
 0x201   : > { %v1044_v20 = vmul.f32 0.5, %v1043_v39 }
 0x202   : > { %1081 = vst [vmem:[%s2018_s30 + $0x70] sm:$0xff] %v1065_v42 }
 0x203   : > { %v1045_v34 = vsub.f32 1.5, %v1044_v20 }
 0x205   : > { %v1046_v26 = vmul.f32 %v1349_v48, %v1045_v34 }
 0x207   : > { %v1050_v40 = vsel %vm1049_vm15, %v1349_v48, %v1046_v26 }
 0x208   : > { %v1066_v27 = vmul.f32 %v1050_v40, %v2012_v16 }
 0x20a   : > { %1082 = vst [vmem:[%s2018_s30 + $0x78] sm:$0xff] %v1066_v27 }
 0x20b   : > { %1497 = shalt.err (!%p1494_p9)
}
 0x20c   : > { %s1556_s3 = smov 128   ;;  %s1557_s29 = smov 8  }
 0x20d   : > { %1251 = dma.vmem_to_hbm [thread:$0]  (%p1654_p3), %s1097_s8, 2048, %s1099_s9, %s1084_s22, %s1556_s3, %s1556_s3, %s1557_s29  }
 0x20e PF: > { %s1113_s28 = sand.u32 1, %s1536_s18   ;;  %p2105_p12 = scmp.ge.s32.totalorder %s1548_s21, 2 }
 0x20f   : > { %s1114_s11 = scalar_lea.sflag [#allocation4], %s1113_s28 }
 0x210   : > { %p1268_p13 = pnand %p2105_p12, %p1623_p6 }
 0x212   : > { %p1269_p0 = pneg %p1268_p13 }
 0x214   : > { %1531 = dma.done.wait (%p1269_p0), %s1114_s11, 2048  }
 0x215   : > { %1533 = vsyncadd (%p1269_p0), %s1114_s11, 4294965248  ;;  %s2106_s24 = sld [smem:[#allocation16_spill]]  ;;  %p22_p5 = scmp.ge.s32.totalorder %s1644_s14, 4  }
 0x216   : > { %s2107_s18 = smov %s1540_s19  ;;  %s2108_s19 = smov %s1544_s20 }
 0x217   : > { %s2110_s21 = smov %s1644_s14  ;;  %24 = sbr.rel (!%p22_p5) target bundleno = 12 (0xc), region = 106 }
 0x21b   : > { %s2109_s20 = smov %s2106_s24 }
 0x21c   :  { %1120 = vsyncpa [#allocation3], 1 }
 0x21d   :  { %1122 = vsyncpa [#allocation3 + $0x1], 1 }
 0x21e   :  { %1123 = vsyncpa [#allocation6], 1 }
 0x21f   :  { %1125 = vsyncpa [#allocation6 + $0x1], 1 }
 0x220   :  { %1126 = vsyncpa [#allocation9], 1 }
 0x221   :  { %1127 = vsyncpa [#allocation4], 1 }
 0x222   :  { %1129 = vsyncpa [#allocation4 + $0x1], 1 }

</bundles_post_ra>
